<compile_context>
chip_gen: v6e
topology: v6e:2x2x1
jax: 0.10.0
libtpu: 0.0.40
codegen_flags: <defaults>
</compile_context>

<pallas_src>
import math

import jax
import jax.numpy as jnp
import numpy as np
from jax import lax
from jax.experimental import pallas as pl
from jax.experimental.pallas import tpu as pltpu

EPS = 1e-5                                # BatchNorm2d default eps
VMEM_LIMIT_BYTES = 32 * 1024 * 1024       # safe scoped-VMEM limit on v5e/v6e/v7x


def _round_up(a, b):
    return (a + b - 1) // b * b


def _pick_cols(tv_out, c_in, c_out, k, stride, tail,
               vmem_budget_bytes=12 * 1024 * 1024):
    """Lane columns per grid step, sized against a real VMEM budget.

    (Review item 6: the old min(4096, ...) clamp is gone.)  Per-column
    footprint: double-buffered bf16 phase inputs, in-kernel halo/tap
    temporaries, the f32 accumulator and the double-buffered f32 output block.
    """
    bytes_per_col = (
        2 * stride * c_in * 2      # phase main blocks, double-buffered, bf16
        + stride * c_in * 2        # halo concat temporaries, bf16
        + k * c_in * 2             # tap slices (upper bound), bf16
        + c_out * 4                # f32 matmul accumulator
        + 2 * c_out * 4            # f32 output block, double-buffered
    )
    cap = max(tail, (vmem_budget_bytes // max(bytes_per_col, 1)) // 128 * 128)
    cols = min(cap, _round_up(tv_out, 128))
    return max(tail, _round_up(cols, tail))


def _conv_block(w_ref, phase_refs, *, kernel_size, stride, v, cols):
    """Recompute one (C_out, cols) conv block from the bf16 phase inputs.

    phase_refs = (main_0..main_{s-1}, tail_0..tail_{s-1}).  Tap k of the (K,1)
    conv is a static lane shift of (k//stride)*V columns in phase k%stride.
    Each tap feeds one small MXU matmul accumulated in f32: the kernel is
    HBM-bound so K small MXU pushes cost the same as one big one, and this
    avoids a sub-(16,128)-tile sublane concatenate for C_in=4 (which also makes
    the reviewed "pad KC=36->48" item moot - there is no (KC, cols) tile).
    """
    halos = []
    for p in range(stride):
        main = phase_refs[p][0]                 # (C_in, cols)  bf16
        tail = phase_refs[stride + p][0]        # (C_in, TAIL)  bf16
        halos.append(jnp.concatenate([main, tail], axis=-1))

    acc = None
    for k in range(kernel_size):
        off = (k // stride) * v
        tap = halos[k % stride][:, off:off + cols]          # (C_in, cols) bf16
        part = jnp.dot(w_ref[k], tap, preferred_element_type=jnp.float32)
        acc = part if acc is None else acc + part
    return acc                                              # (C_out, cols) f32


def _make_stats_kernel(*, kernel_size, stride, v, cols, nj, tv_valid, tv_pad):
    """Pass 1: recompute conv block, accumulate per-sample sum / sum-of-squares."""
    n_phase_refs = 2 * stride

    def kernel(*refs):
        w_ref = refs[0]
        phase_refs = refs[1:1 + n_phase_refs]
        sum_ref = refs[1 + n_phase_refs]
        ssq_ref = refs[2 + n_phase_refs]
        j = pl.program_id(1)

        @pl.when(j == 0)
        def _init():
            sum_ref[...] = jnp.zeros_like(sum_ref)
            ssq_ref[...] = jnp.zeros_like(ssq_ref)

        acc = _conv_block(w_ref, phase_refs, kernel_size=kernel_size,
                          stride=stride, v=v, cols=cols)

        def _accumulate(a):
            sum_ref[...] += jnp.sum(a, axis=-1, keepdims=True).reshape(sum_ref.shape)
            ssq_ref[...] += jnp.sum(a * a, axis=-1, keepdims=True).reshape(ssq_ref.shape)

        if tv_pad == tv_valid:
            # every column is a real (t_out, v) position: no mask anywhere
            _accumulate(acc)
        else:
            # review item 8: mask padded tail columns out of the batch
            # statistics only on the LAST column block
            last = nj - 1
            valid_last = tv_valid - last * cols

            @pl.when(j != last)
            def _full():
                _accumulate(acc)

            @pl.when(j == last)
            def _masked():
                col = lax.broadcasted_iota(jnp.int32, acc.shape, 1)
                _accumulate(jnp.where(col < valid_last, acc, 0.0))

    return kernel


def _make_apply_kernel(*, kernel_size, stride, v, cols):
    """Pass 2: recompute conv block, fuse y = conv * scale + shift, write NCHW-compatible."""
    n_phase_refs = 2 * stride

    def kernel(*refs):
        w_ref, scale_ref, shift_ref = refs[0], refs[1], refs[2]
        phase_refs = refs[3:3 + n_phase_refs]
        o_ref = refs[3 + n_phase_refs]

        acc = _conv_block(w_ref, phase_refs, kernel_size=kernel_size,
                          stride=stride, v=v, cols=cols)
        o_ref[0] = acc * scale_ref[...] + shift_ref[...]

    return kernel


def unit_tcn_forward(x_nchw, weight, bias, gamma, beta, *, kernel_size=9, stride=1,
                     max_cols=None, phase_buffering=None):
    """x_nchw: (N, C_in, T, V) f32, weight: (C_out, C_in, K, 1). Returns NCHW f32.

    phase_buffering: optional input pipeline depth (review item 9: try 3 on
    v5e if profiling shows exposed DMA at step boundaries); default None keeps
    the standard double buffering.
    """
    N, C_in, T, V = x_nchw.shape
    C_out = weight.shape[0]
    K = int(kernel_size)
    s = int(stride)
    pad = (K - 1) // 2
    T_out = (T + 2 * pad - K) // s + 1
    TV_out = T_out * V

    halo_cols = ((K - 1) // s) * V                          # per-phase temporal halo
    tail = max(128, _round_up(max(halo_cols, 1), 128))
    cols = _pick_cols(TV_out, C_in, C_out, K, s, tail)
    if max_cols is not None:
        cols = min(cols, max(tail, (int(max_cols) // tail) * tail))
    nj = -(-TV_out // cols)
    tv_pad = nj * cols
    tv_in = tv_pad + tail

    # ---------------- wrapper glue (layout only, no im2col slab) --------------
    # bf16 cast FIRST (review item 2), zero-pad T for the conv, split into
    # `stride` temporal phases, flatten (T, V) per sample (free row-major
    # merge), pad/trim columns so the halo-tail block of the last grid step is
    # in bounds.  Total extra HBM traffic ~2x the input, not ~K=9x.
    x_bf = x_nchw.astype(jnp.bfloat16)
    x_p = jnp.pad(x_bf, ((0, 0), (0, 0), (pad, pad), (0, 0)))
    phases = []
    for p in range(s):
        ph = x_p[:, :, p::s, :].reshape(N, C_in, -1)        # (N, C_in, T_p*V)
        have = ph.shape[-1]
        if have < tv_in:
            ph = jnp.pad(ph, ((0, 0), (0, 0), (0, tv_in - have)))
        elif have > tv_in:
            ph = ph[:, :, :tv_in]
        phases.append(ph)

    w_taps = jnp.transpose(weight[:, :, :, 0], (2, 0, 1)).astype(jnp.bfloat16)  # (K, C_out, C_in)

    main_kwargs = {}
    if phase_buffering is not None:
        main_kwargs["pipeline_mode"] = pl.Buffered(int(phase_buffering))
    main_spec = pl.BlockSpec((1, C_in, cols), lambda n, j: (n, 0, j), **main_kwargs)
    tail_blocks_per_main = cols // tail
    tail_spec = pl.BlockSpec((1, C_in, tail),
                             lambda n, j: (n, 0, (j + 1) * tail_blocks_per_main))
    w_spec = pl.BlockSpec((K, C_out, C_in), lambda n, j: (0, 0, 0))
    chan_spec = pl.BlockSpec((C_out, 1), lambda n, j: (0, 0))
    stat_spec = pl.BlockSpec((1, C_out, 1), lambda n, j: (n, 0, 0))
    out_spec = pl.BlockSpec((1, C_out, cols), lambda n, j: (n, 0, j))

    grid = (N, nj)

    # ---- pass 1: conv recompute + per-sample BN partial statistics ----------
    sums, ssqs = pl.pallas_call(
        _make_stats_kernel(kernel_size=K, stride=s, v=V, cols=cols,
                           nj=nj, tv_valid=TV_out, tv_pad=tv_pad),
        out_shape=(jax.ShapeDtypeStruct((N, C_out, 1), jnp.float32),
                   jax.ShapeDtypeStruct((N, C_out, 1), jnp.float32)),
        grid=grid,
        in_specs=[w_spec] + [main_spec] * s + [tail_spec] * s,
        out_specs=(stat_spec, stat_spec),
        compiler_params=pltpu.CompilerParams(
            # N 'parallel': on v7x each TensorCore owns disjoint samples and
            # its own partial-stat columns (review item 5); the column axis is
            # the sequential reduction axis.
            # TODO(synk): for N == 1 on v7x, split the column axis into two
            # parallel halves (per-half partials) to use both TensorCores.
            dimension_semantics=("parallel", "arbitrary"),
            vmem_limit_bytes=VMEM_LIMIT_BYTES),
    )(w_taps, *phases, *phases)

    # tiny (C_out,)-sized channel math stays in XLA.  Per-sample partial sums
    # also reduce the long sequential f32 accumulation (review correctness
    # note on E[x^2]-E[x]^2; a Welford/two-pass form would be safer still).
    cnt = float(N * TV_out)
    sum_wx = jnp.sum(sums, axis=0) / cnt                    # E[W@x]   (C_out, 1)
    ssq_wx = jnp.sum(ssqs, axis=0) / cnt                    # E[(W@x)^2]
    b_col = bias.reshape(C_out, 1).astype(jnp.float32)
    g_col = gamma.reshape(C_out, 1).astype(jnp.float32)
    beta_col = beta.reshape(C_out, 1).astype(jnp.float32)
    var = jnp.maximum(ssq_wx - sum_wx * sum_wx, 0.0)        # bias-invariant
    mean = sum_wx + b_col                                   # mean of (W@x + b)
    scale = g_col * lax.rsqrt(var + EPS)
    shift = beta_col + (b_col - mean) * scale               # y = (W@x)*scale + shift

    # ---- pass 2: conv recompute + fused scale/shift, NCHW-compatible output --
    y = pl.pallas_call(
        _make_apply_kernel(kernel_size=K, stride=s, v=V, cols=cols),
        out_shape=jax.ShapeDtypeStruct((N, C_out, tv_pad), jnp.float32),
        grid=grid,
        in_specs=[w_spec, chan_spec, chan_spec] + [main_spec] * s + [tail_spec] * s,
        out_specs=out_spec,
        compiler_params=pltpu.CompilerParams(
            dimension_semantics=("parallel", "parallel"),
            vmem_limit_bytes=VMEM_LIMIT_BYTES),
    )(w_taps, scale, shift, *phases, *phases)

    # NCHW is a free reshape of the lane-dense channels-first output (review
    # item 4: no full-size XLA transpose); only when T_out*V is not a multiple
    # of 128 does the contiguous slice below copy.
    if tv_pad != TV_out:
        y = y[:, :, :TV_out]
    return y.reshape(N, C_out, T_out, V)


def _reference_forward(x_nchw, weight, bias, gamma, beta, *, kernel_size=9, stride=1):
    pad = (kernel_size - 1) // 2
    y = lax.conv_general_dilated(
        x_nchw, weight,
        window_strides=(stride, 1),
        padding=((pad, pad), (0, 0)),
        dimension_numbers=("NCHW", "OIHW", "NCHW"),
        precision=lax.Precision.HIGHEST,
    ) + bias.reshape(1, -1, 1, 1)
    mean = jnp.mean(y, axis=(0, 2, 3), keepdims=True)
    var = jnp.mean((y - mean) ** 2, axis=(0, 2, 3), keepdims=True)
    return (y - mean) * lax.rsqrt(var + EPS) * gamma.reshape(1, -1, 1, 1) + beta.reshape(1, -1, 1, 1)


if __name__ == "__main__":
    # Small shapes consistent with unit_tcn's NCHW = (N, C, T, V) convention.
    N, C_in, C_out, V = 2, 4, 8, 16
    K = 9
    T_full = 16

    key = jax.random.PRNGKey(0)
    kx, kw, kb, kg, kbt = jax.random.split(key, 5)

    x_full = jax.random.normal(kx, (N, C_in, T_full, V), dtype=jnp.float32)
    # conv_init: kaiming_normal_(mode='fan_out') -> std = sqrt(2 / (C_out*K*1))
    w = jax.random.normal(kw, (C_out, C_in, K, 1), dtype=jnp.float32) * math.sqrt(2.0 / (C_out * K))
    # perturbed bias / BN affine so those code paths are exercised (the conv
    # bias cancels under training-mode BN, in both kernel and reference)
    b = 0.1 * jax.random.normal(kb, (C_out,), dtype=jnp.float32)
    gamma = 1.0 + 0.1 * jax.random.normal(kg, (C_out,), dtype=jnp.float32)
    beta = 0.1 * jax.random.normal(kbt, (C_out,), dtype=jnp.float32)

    w_bf = w.astype(jnp.bfloat16).astype(jnp.float32)

    # (T, stride, max_cols): max_cols=128 forces a 2-step column grid (resident
    # per-sample stats accumulator + pl.when init); stride=2 exercises the
    # two-phase tap path; T=14 exercises the masked-stats / padded-column path.
    configs = ((16, 1, None), (16, 1, 128), (16, 2, None), (14, 1, None))
    for T, stride, max_cols in configs:
        x = x_full[:, :, :T, :]
        out = unit_tcn_forward(x, w, b, gamma, beta, kernel_size=K, stride=stride,
                               max_cols=max_cols)
        out = jax.block_until_ready(out)

        # tight reference: bf16-rounded operands, f32 conv (isolates kernel
        # logic from the intentional bf16 MXU cast)
        x_bf = x.astype(jnp.bfloat16).astype(jnp.float32)
        ref_tight = _reference_forward(x_bf, w_bf, b, gamma, beta,
                                       kernel_size=K, stride=stride)
        np.testing.assert_allclose(np.asarray(out), np.asarray(ref_tight),
                                   atol=1e-4, rtol=1e-4)

        ref_f32 = _reference_forward(x, w, b, gamma, beta,
                                     kernel_size=K, stride=stride)
        np.testing.assert_allclose(np.asarray(out), np.asarray(ref_f32),
                                   atol=3e-2, rtol=3e-2)

    print("KERNEL_OK")
</pallas_src>

<mosaic_0001>
module attributes {stable_mosaic.version = 11 : i64} {
  func.func @kernel(%arg0: i32, %arg1: i32, %arg2: memref<9x8x4xbf16, #tpu.memory_space<vmem>>, %arg3: memref<1x4x256xbf16, #tpu.memory_space<vmem>>, %arg4: memref<1x4x128xbf16, #tpu.memory_space<vmem>>, %arg5: memref<1x8x1xf32, #tpu.memory_space<vmem>>, %arg6: memref<1x8x1xf32, #tpu.memory_space<vmem>>) attributes {dimension_semantics = [#tpu.dimension_semantics<parallel>, #tpu.dimension_semantics<arbitrary>], iteration_bounds = array<i64: 2, 1>, scalar_prefetch = 0 : i64, scratch_operands = 0 : i64, tpu.core_type = #tpu.core_type<tc>, window_params = [{pipeline_mode = #tpu.pipeline_mode<synchronous>, transform_indices = @transform_0, window_bounds = array<i64: 9, 8, 4>}, {transform_indices = @transform_1, window_bounds = array<i64: 1, 4, 256>}, {transform_indices = @transform_2, window_bounds = array<i64: 1, 4, 128>}, {transform_indices = @transform_3, window_bounds = array<i64: 1, 8, 1>}, {transform_indices = @transform_4, window_bounds = array<i64: 1, 8, 1>}]} {
    %c0_i32 = arith.constant 0 : i32
    %0 = arith.cmpi eq, %arg1, %c0_i32 : i32
    %1 = arith.extui %0 : i1 to i32
    %c0_i32_0 = arith.constant 0 : i32
    %2 = arith.cmpi ne, %1, %c0_i32_0 : i32
    scf.if %2 {
      %cst_47 = arith.constant 0.000000e+00 : f32
      %65 = vector.broadcast %cst_47 : f32 to vector<1x8x1xf32>
      %c0_48 = arith.constant 0 : index
      %c0_49 = arith.constant 0 : index
      %c0_50 = arith.constant 0 : index
      %66 = vector.load %arg5[%c0_48, %c0_49, %c0_50] : memref<1x8x1xf32, #tpu.memory_space<vmem>>, vector<1x8x1xf32>
      tpu.vector_store %arg5[%c0_48, %c0_49, %c0_50], %65 {strides = array<i32>} : memref<1x8x1xf32, #tpu.memory_space<vmem>>, vector<1x8x1xf32>,
      %cst_51 = arith.constant 0.000000e+00 : f32
      %67 = vector.broadcast %cst_51 : f32 to vector<1x8x1xf32>
      %c0_52 = arith.constant 0 : index
      %c0_53 = arith.constant 0 : index
      %c0_54 = arith.constant 0 : index
      %68 = vector.load %arg6[%c0_52, %c0_53, %c0_54] : memref<1x8x1xf32, #tpu.memory_space<vmem>>, vector<1x8x1xf32>
      tpu.vector_store %arg6[%c0_52, %c0_53, %c0_54], %67 {strides = array<i32>} : memref<1x8x1xf32, #tpu.memory_space<vmem>>, vector<1x8x1xf32>,
    } else {
    }
    %c0 = arith.constant 0 : index
    %c0_1 = arith.constant 0 : index
    %c0_2 = arith.constant 0 : index
    %3 = vector.load %arg3[%c0, %c0_1, %c0_2] : memref<1x4x256xbf16, #tpu.memory_space<vmem>>, vector<1x4x256xbf16>
    %4 = vector.shape_cast %3 : vector<1x4x256xbf16> to vector<4x256xbf16>
    %c0_3 = arith.constant 0 : index
    %c0_4 = arith.constant 0 : index
    %c0_5 = arith.constant 0 : index
    %5 = vector.load %arg4[%c0_3, %c0_4, %c0_5] : memref<1x4x128xbf16, #tpu.memory_space<vmem>>, vector<1x4x128xbf16>
    %6 = vector.shape_cast %5 : vector<1x4x128xbf16> to vector<4x128xbf16>
    %7 = tpu.concatenate %4, %6 in 1 : vector<4x256xbf16>, vector<4x128xbf16> -> vector<4x384xbf16>
    %8 = vector.extract_strided_slice %7 {offsets = [0, 0], sizes = [4, 256], strides = [1, 1]} : vector<4x384xbf16> to vector<4x256xbf16>
    %c0_6 = arith.constant 0 : index
    %c0_7 = arith.constant 0 : index
    %c0_8 = arith.constant 0 : index
    %9 = vector.load %arg2[%c0_6, %c0_7, %c0_8] : memref<9x8x4xbf16, #tpu.memory_space<vmem>>, vector<1x8x4xbf16>
    %10 = vector.shape_cast %9 : vector<1x8x4xbf16> to vector<8x4xbf16>
    %cst = arith.constant dense<0.000000e+00> : vector<8x256xf32>
    %11 = tpu.matmul %10, %8, %cst {dimension_numbers = #tpu.dot_dimension_numbers<[1], [0], [0], [1], [0, 0, 1, 1], [], []>} : vector<8x4xbf16>, vector<4x256xbf16>, vector<8x256xf32> -> vector<8x256xf32>
    %12 = vector.extract_strided_slice %7 {offsets = [0, 16], sizes = [4, 256], strides = [1, 1]} : vector<4x384xbf16> to vector<4x256xbf16>
    %c1 = arith.constant 1 : index
    %c0_9 = arith.constant 0 : index
    %c0_10 = arith.constant 0 : index
    %13 = vector.load %arg2[%c1, %c0_9, %c0_10] : memref<9x8x4xbf16, #tpu.memory_space<vmem>>, vector<1x8x4xbf16>
    %14 = vector.shape_cast %13 : vector<1x8x4xbf16> to vector<8x4xbf16>
    %cst_11 = arith.constant dense<0.000000e+00> : vector<8x256xf32>
    %15 = tpu.matmul %14, %12, %cst_11 {dimension_numbers = #tpu.dot_dimension_numbers<[1], [0], [0], [1], [0, 0, 1, 1], [], []>} : vector<8x4xbf16>, vector<4x256xbf16>, vector<8x256xf32> -> vector<8x256xf32>
    %16 = arith.addf %11, %15 : vector<8x256xf32>
    %17 = vector.extract_strided_slice %7 {offsets = [0, 32], sizes = [4, 256], strides = [1, 1]} : vector<4x384xbf16> to vector<4x256xbf16>
    %c2 = arith.constant 2 : index
    %c0_12 = arith.constant 0 : index
    %c0_13 = arith.constant 0 : index
    %18 = vector.load %arg2[%c2, %c0_12, %c0_13] : memref<9x8x4xbf16, #tpu.memory_space<vmem>>, vector<1x8x4xbf16>
    %19 = vector.shape_cast %18 : vector<1x8x4xbf16> to vector<8x4xbf16>
    %cst_14 = arith.constant dense<0.000000e+00> : vector<8x256xf32>
    %20 = tpu.matmul %19, %17, %cst_14 {dimension_numbers = #tpu.dot_dimension_numbers<[1], [0], [0], [1], [0, 0, 1, 1], [], []>} : vector<8x4xbf16>, vector<4x256xbf16>, vector<8x256xf32> -> vector<8x256xf32>
    %21 = arith.addf %16, %20 : vector<8x256xf32>
    %22 = vector.extract_strided_slice %7 {offsets = [0, 48], sizes = [4, 256], strides = [1, 1]} : vector<4x384xbf16> to vector<4x256xbf16>
    %c3 = arith.constant 3 : index
    %c0_15 = arith.constant 0 : index
    %c0_16 = arith.constant 0 : index
    %23 = vector.load %arg2[%c3, %c0_15, %c0_16] : memref<9x8x4xbf16, #tpu.memory_space<vmem>>, vector<1x8x4xbf16>
    %24 = vector.shape_cast %23 : vector<1x8x4xbf16> to vector<8x4xbf16>
    %cst_17 = arith.constant dense<0.000000e+00> : vector<8x256xf32>
    %25 = tpu.matmul %24, %22, %cst_17 {dimension_numbers = #tpu.dot_dimension_numbers<[1], [0], [0], [1], [0, 0, 1, 1], [], []>} : vector<8x4xbf16>, vector<4x256xbf16>, vector<8x256xf32> -> vector<8x256xf32>
    %26 = arith.addf %21, %25 : vector<8x256xf32>
    %27 = vector.extract_strided_slice %7 {offsets = [0, 64], sizes = [4, 256], strides = [1, 1]} : vector<4x384xbf16> to vector<4x256xbf16>
    %c4 = arith.constant 4 : index
    %c0_18 = arith.constant 0 : index
    %c0_19 = arith.constant 0 : index
    %28 = vector.load %arg2[%c4, %c0_18, %c0_19] : memref<9x8x4xbf16, #tpu.memory_space<vmem>>, vector<1x8x4xbf16>
    %29 = vector.shape_cast %28 : vector<1x8x4xbf16> to vector<8x4xbf16>
    %cst_20 = arith.constant dense<0.000000e+00> : vector<8x256xf32>
    %30 = tpu.matmul %29, %27, %cst_20 {dimension_numbers = #tpu.dot_dimension_numbers<[1], [0], [0], [1], [0, 0, 1, 1], [], []>} : vector<8x4xbf16>, vector<4x256xbf16>, vector<8x256xf32> -> vector<8x256xf32>
    %31 = arith.addf %26, %30 : vector<8x256xf32>
    %32 = vector.extract_strided_slice %7 {offsets = [0, 80], sizes = [4, 256], strides = [1, 1]} : vector<4x384xbf16> to vector<4x256xbf16>
    %c5 = arith.constant 5 : index
    %c0_21 = arith.constant 0 : index
    %c0_22 = arith.constant 0 : index
    %33 = vector.load %arg2[%c5, %c0_21, %c0_22] : memref<9x8x4xbf16, #tpu.memory_space<vmem>>, vector<1x8x4xbf16>
    %34 = vector.shape_cast %33 : vector<1x8x4xbf16> to vector<8x4xbf16>
    %cst_23 = arith.constant dense<0.000000e+00> : vector<8x256xf32>
    %35 = tpu.matmul %34, %32, %cst_23 {dimension_numbers = #tpu.dot_dimension_numbers<[1], [0], [0], [1], [0, 0, 1, 1], [], []>} : vector<8x4xbf16>, vector<4x256xbf16>, vector<8x256xf32> -> vector<8x256xf32>
    %36 = arith.addf %31, %35 : vector<8x256xf32>
    %37 = vector.extract_strided_slice %7 {offsets = [0, 96], sizes = [4, 256], strides = [1, 1]} : vector<4x384xbf16> to vector<4x256xbf16>
    %c6 = arith.constant 6 : index
    %c0_24 = arith.constant 0 : index
    %c0_25 = arith.constant 0 : index
    %38 = vector.load %arg2[%c6, %c0_24, %c0_25] : memref<9x8x4xbf16, #tpu.memory_space<vmem>>, vector<1x8x4xbf16>
    %39 = vector.shape_cast %38 : vector<1x8x4xbf16> to vector<8x4xbf16>
    %cst_26 = arith.constant dense<0.000000e+00> : vector<8x256xf32>
    %40 = tpu.matmul %39, %37, %cst_26 {dimension_numbers = #tpu.dot_dimension_numbers<[1], [0], [0], [1], [0, 0, 1, 1], [], []>} : vector<8x4xbf16>, vector<4x256xbf16>, vector<8x256xf32> -> vector<8x256xf32>
    %41 = arith.addf %36, %40 : vector<8x256xf32>
    %42 = vector.extract_strided_slice %7 {offsets = [0, 112], sizes = [4, 256], strides = [1, 1]} : vector<4x384xbf16> to vector<4x256xbf16>
    %c7 = arith.constant 7 : index
    %c0_27 = arith.constant 0 : index
    %c0_28 = arith.constant 0 : index
    %43 = vector.load %arg2[%c7, %c0_27, %c0_28] : memref<9x8x4xbf16, #tpu.memory_space<vmem>>, vector<1x8x4xbf16>
    %44 = vector.shape_cast %43 : vector<1x8x4xbf16> to vector<8x4xbf16>
    %cst_29 = arith.constant dense<0.000000e+00> : vector<8x256xf32>
    %45 = tpu.matmul %44, %42, %cst_29 {dimension_numbers = #tpu.dot_dimension_numbers<[1], [0], [0], [1], [0, 0, 1, 1], [], []>} : vector<8x4xbf16>, vector<4x256xbf16>, vector<8x256xf32> -> vector<8x256xf32>
    %46 = arith.addf %41, %45 : vector<8x256xf32>
    %47 = vector.extract_strided_slice %7 {offsets = [0, 128], sizes = [4, 256], strides = [1, 1]} : vector<4x384xbf16> to vector<4x256xbf16>
    %c8 = arith.constant 8 : index
    %c0_30 = arith.constant 0 : index
    %c0_31 = arith.constant 0 : index
    %48 = vector.load %arg2[%c8, %c0_30, %c0_31] : memref<9x8x4xbf16, #tpu.memory_space<vmem>>, vector<1x8x4xbf16>
    %49 = vector.shape_cast %48 : vector<1x8x4xbf16> to vector<8x4xbf16>
    %cst_32 = arith.constant dense<0.000000e+00> : vector<8x256xf32>
    %50 = tpu.matmul %49, %47, %cst_32 {dimension_numbers = #tpu.dot_dimension_numbers<[1], [0], [0], [1], [0, 0, 1, 1], [], []>} : vector<8x4xbf16>, vector<4x256xbf16>, vector<8x256xf32> -> vector<8x256xf32>
    %51 = arith.addf %46, %50 : vector<8x256xf32>
    %c0_33 = arith.constant 0 : index
    %c0_34 = arith.constant 0 : index
    %c0_35 = arith.constant 0 : index
    %52 = vector.load %arg5[%c0_33, %c0_34, %c0_35] : memref<1x8x1xf32, #tpu.memory_space<vmem>>, vector<1x8x1xf32>
    %cst_36 = arith.constant dense<0.000000e+00> : vector<8xf32>
    %53 = vector.multi_reduction <add>, %51, %cst_36 [1] : vector<8x256xf32> to vector<8xf32>
    %54 = vector.shape_cast %53 : vector<8xf32> to vector<8x1xf32>
    %55 = vector.shape_cast %54 : vector<8x1xf32> to vector<1x8x1xf32>
    %56 = arith.addf %52, %55 : vector<1x8x1xf32>
    %c0_37 = arith.constant 0 : index
    %c0_38 = arith.constant 0 : index
    %c0_39 = arith.constant 0 : index
    %57 = vector.load %arg5[%c0_37, %c0_38, %c0_39] : memref<1x8x1xf32, #tpu.memory_space<vmem>>, vector<1x8x1xf32>
    tpu.vector_store %arg5[%c0_37, %c0_38, %c0_39], %56 {strides = array<i32>} : memref<1x8x1xf32, #tpu.memory_space<vmem>>, vector<1x8x1xf32>,
    %c0_40 = arith.constant 0 : index
    %c0_41 = arith.constant 0 : index
    %c0_42 = arith.constant 0 : index
    %58 = vector.load %arg6[%c0_40, %c0_41, %c0_42] : memref<1x8x1xf32, #tpu.memory_space<vmem>>, vector<1x8x1xf32>
    %59 = arith.mulf %51, %51 : vector<8x256xf32>
    %cst_43 = arith.constant dense<0.000000e+00> : vector<8xf32>
    %60 = vector.multi_reduction <add>, %59, %cst_43 [1] : vector<8x256xf32> to vector<8xf32>
    %61 = vector.shape_cast %60 : vector<8xf32> to vector<8x1xf32>
    %62 = vector.shape_cast %61 : vector<8x1xf32> to vector<1x8x1xf32>
    %63 = arith.addf %58, %62 : vector<1x8x1xf32>
    %c0_44 = arith.constant 0 : index
    %c0_45 = arith.constant 0 : index
    %c0_46 = arith.constant 0 : index
    %64 = vector.load %arg6[%c0_44, %c0_45, %c0_46] : memref<1x8x1xf32, #tpu.memory_space<vmem>>, vector<1x8x1xf32>
    tpu.vector_store %arg6[%c0_44, %c0_45, %c0_46], %63 {strides = array<i32>} : memref<1x8x1xf32, #tpu.memory_space<vmem>>, vector<1x8x1xf32>,
    return
  }
  func.func @transform_0(%arg0: i32, %arg1: i32) -> (i32, i32, i32) {
    %c0_i32 = arith.constant 0 : i32
    %c0_i32_0 = arith.constant 0 : i32
    %c0_i32_1 = arith.constant 0 : i32
    %c0_i32_2 = arith.constant 0 : i32
    return %c0_i32, %c0_i32_0, %c0_i32_1 : i32, i32, i32
  }
  func.func @transform_1(%arg0: i32, %arg1: i32) -> (i32, i32, i32) {
    %c0_i32 = arith.constant 0 : i32
    %c0_i32_0 = arith.constant 0 : i32
    return %arg0, %c0_i32, %arg1 : i32, i32, i32
  }
  func.func @transform_2(%arg0: i32, %arg1: i32) -> (i32, i32, i32) {
    %c1_i32 = arith.constant 1 : i32
    %0 = arith.addi %arg1, %c1_i32 : i32
    %c2_i32 = arith.constant 2 : i32
    %1 = arith.muli %0, %c2_i32 : i32
    %c0_i32 = arith.constant 0 : i32
    %c0_i32_0 = arith.constant 0 : i32
    return %arg0, %c0_i32, %1 : i32, i32, i32
  }
  func.func @transform_3(%arg0: i32, %arg1: i32) -> (i32, i32, i32) {
    %c0_i32 = arith.constant 0 : i32
    %c0_i32_0 = arith.constant 0 : i32
    %c0_i32_1 = arith.constant 0 : i32
    return %arg0, %c0_i32, %c0_i32_0 : i32, i32, i32
  }
  func.func @transform_4(%arg0: i32, %arg1: i32) -> (i32, i32, i32) {
    %c0_i32 = arith.constant 0 : i32
    %c0_i32_0 = arith.constant 0 : i32
    %c0_i32_1 = arith.constant 0 : i32
    return %arg0, %c0_i32, %c0_i32_0 : i32, i32, i32
  }
}

</mosaic_0001>

<bundles_post_ra>
// kernel: tpu_custom_call.1
= control target key start
LH: loop header
LB: loop body
LE: loop exit
PB: predicated region body
PF: predicated region fallthrough
CT: control target
= control target key end

     0   :  { %s1128_s15 = smov 0   ;;  %s1130_s16 = smov 0   ;;  %s1268_s0 = inlined_call_operand.vmem [shape: bf16[9,8,4], index: 0, kind: input, shape index: {}]   ;;  %s1269_s1 = inlined_call_operand.vmem [shape: bf16[2,4,384], index: 1, kind: input, shape index: {}]   ;;  %s1270_s2 = inlined_call_operand.vmem [shape: bf16[2,4,384], index: 2, kind: input, shape index: {}]   ;;  %s1271_s3 = inlined_call_operand.vmem [shape: f32[2,8,1], index: 3, kind: output, shape index: {0}]   ;;  %s1272_s4 = inlined_call_operand.vmem [shape: f32[2,8,1], index: 4, kind: output, shape index: {1}]  }
   0x1   :  { %s1132_s17 = smov 0  }
   0x2 LB: > { %s27_s18 = sadd.s32 1, %s1088_s16  ;;  %p998_p0 = scmp.ge.s32.totalorder %s1092_s17, 1  ;;  %s1092_s17 = sphi %s1132_s17, %s15_s17   ;;  %s1088_s16 = sphi %s1130_s16, %s1274_s16   ;;  %s1084_s15 = sphi %s1128_s15, %s1273_s15  }
   0x3   : > { %p29_p1 = scmp.ge.s32.totalorder %s27_s18, 2  ;;  %p215_p2 = scmp.lt.s32.totalorder %s1092_s17, 3 }
   0x5   : > { %s1276_s18 = smov (%p29_p1, %s27_s18), 0  ;;  %p216_p3 = pnand %p998_p0, %p215_p2 }
   0x6   : > { %p267_p4 = scmp.lt.s32.totalorder (!%p216_p3), %s1084_s15, 1  ;;  %s1095_s27 = smov (!%p216_p3), 96  }
   0x7   : > { %219 = sbr.rel (%p216_p3) target bundleno = 521 (0x209), region = 32  ;;  %s1096_s28 = smov (!%p216_p3), 112  }
   0x8   : > { %s1097_s5 = smov (!%p216_p3), 80   ;;  %s1098_s6 = smov (!%p216_p3), 64  }
   0x9   : > { %s1099_s7 = smov (!%p216_p3), 48   ;;  %s1100_s8 = smov (!%p216_p3), 32  }
   0xa   : > { %s1101_s9 = smov (!%p216_p3), 16  }
   0xc   : > { %s1278_s15 = smov (!%p267_p4, %s1084_s15), 1  ;;  %v1094_v0 = vmov 0   ;;  %vm336_vm0 = vcmask 1041408   ;;  %v319_v5 = vld [vmem:[%s1268_s0] sm:$0xf]  ;;  %vm332_vm1 = vcmask 31744  }
   0xd   : > { %375 = vmatprep.mubr.bf16.mxu0 %v1094_v0  ;;  %425 = vmatprep.mubr.bf16.mxu1 %v1094_v0  ;;  %s1034_s19 = smul.u32 6, %s1278_s15  ;;  %vm329_vm2 = vcmask 916480   ;;  %vm442_vm3 = vcmask 785408   ;;  %v1004_v13 = vld [vmem:[%s1268_s0 + $0x4] sm:$0xf]  ;;  %vm505_vm4 = vcmask 654336  }
   0xe   : > { %v1009_v22 = vld [vmem:[%s1268_s0 + $0x8] sm:$0xf]  ;;  %vm568_vm5 = vcmask 523264   ;;  %v1012_v27 = vld [vmem:[%s1268_s0 + $0xc] sm:$0xf]  ;;  %vm631_vm6 = vcmask 392192  }
   0xf   : > { %s274_s22 = scalar_lea.vmem %s1269_s1, %s1034_s19  ;;  %s1033_s23 = sadd.s32 4, %s1034_s19  ;;  %v1015_v33 = vld [vmem:[%s1268_s0 + $0x10] sm:$0xf]  ;;  %vm694_vm7 = vcmask 261120   ;;  %v1018_v41 = vld [vmem:[%s1268_s0 + $0x14] sm:$0xf] }
  0x10   : > { %v1003_v1 = vld.sshfl [vmem:[%s274_s22] sm:$0x33 pattern:$0x76325410]  ;;  %s289_s26 = scalar_lea.vmem %s1270_s2, %s1033_s23  ;;  %v1021_v47 = vld [vmem:[%s1268_s0 + $0x18] sm:$0xf] }
  0x11   : > { %436 = vrot.lane.b32.xlu1 %v1003_v1, %s1095_s27  ;;  %323 = vrot.lane.b32.xlu0 %v1003_v1, %s1096_s28  ;;  %v1157_v2 = vcombine.high %v1003_v1, %v1003_v1  ;;  %v388_v3 = vsel %vm336_vm0, %v1003_v1, 0  ;;  %v1160_v4 = vld [vmem:[%s289_s26] sm:$0x3]  ;;  %vm757_vm8 = vcmask 130048   ;;  %v1024_v55 = vld [vmem:[%s1268_s0 + $0x1c] sm:$0xf] }
  0x12   : > { %v1027_v56 = vld [vmem:[%s1268_s0 + $0x20] sm:$0xf]  ;;  %s1001_s30 = sshll.u32 %s1278_s15, 3  ;;  %vm305_vm9 = vcmask 7168   ;;  %v1102_v61 = vmov 0.0  }
  0x13   : > { %1007 = vmatprep.subr.msk.bf16.mxu1 %vm336_vm0, %v1157_v2  ;;  %v391_v50 = vsel %vm336_vm0, %v1157_v2, 0  ;;  %s299_s10 = scalar_lea.vmem %s1272_s4, %s1001_s30 }
  0x14   : > { %408 = vmatpush1.bf16.msra.mxu1 %v388_v3  ;;  %307 = vst.msk [vmem:[%s299_s10] sm:$0xff] %vm305_vm9, %v1102_v61 }
  0x15   : > { %327 = vrot.lane.b32.xlu1 %v1160_v4, %s1096_s28  ;;  %325 = vrot.lane.b32.xlu0 %v1157_v2, %s1096_s28 }
  0x17   : > { %1008 = vmatmul.mubr.msk.bf16.vlgmr.msra.gmra.mxu1 %vm332_vm1, %v319_v5 }
  0x18   : > { %549 = vmatprep.mubr.bf16.mxu1 %v1094_v0 }
  0x19   : > { %440 = vrot.lane.b32.xlu1 %v1160_v4, %s1095_s27  ;;  %438 = vrot.lane.b32.xlu0 %v1157_v2, %s1095_s27 }
  0x1d   : > { %501 = vrot.lane.b32.xlu1 %v1157_v2, %s1097_s5  ;;  %499 = vrot.lane.b32.xlu0 %v1003_v1, %s1097_s5 }
  0x21   : > { %562 = vrot.lane.b32.xlu1 %v1003_v1, %s1098_s6  ;;  %503 = vrot.lane.b32.xlu0 %v1160_v4, %s1097_s5 }
  0x25   : > { %566 = vrot.lane.b32.xlu1 %v1160_v4, %s1098_s6  ;;  %564 = vrot.lane.b32.xlu0 %v1157_v2, %s1098_s6 }
  0x29   : > { %627 = vrot.lane.b32.xlu1 %v1157_v2, %s1099_s7  ;;  %625 = vrot.lane.b32.xlu0 %v1003_v1, %s1099_s7 }
  0x2d   : > { %688 = vrot.lane.b32.xlu1 %v1003_v1, %s1100_s8  ;;  %629 = vrot.lane.b32.xlu0 %v1160_v4, %s1099_s7  ;;  %s1245_s7 = scalar_lea.vmem %s1271_s3, %s1001_s30 }
  0x2e   : > { %306 = vst.msk [vmem:[%s1245_s7] sm:$0xff] %vm305_vm9, %v1102_v61 }
  0x31   : > { %692 = vrot.lane.b32.xlu1 %v1160_v4, %s1100_s8  ;;  %690 = vrot.lane.b32.xlu0 %v1157_v2, %s1100_s8 }
  0x35   : > { %753 = vrot.lane.b32.xlu1 %v1157_v2, %s1101_s9  ;;  %751 = vrot.lane.b32.xlu0 %v1003_v1, %s1101_s9 }
  0x39   : > { %755 = vrot.lane.b32.xlu0 %v1160_v4, %s1101_s9 }
  0x83   : > { %v437_v6 = vpop.permute.xlu1 %436  ;;  %v324_v7 = vpop.permute.xlu0 %323 }
  0x87   : > { %v328_v8 = vpop.permute.xlu1 %327  ;;  %v326_v9 = vpop.permute.xlu0 %325 }
  0x88   : > { %v331_v10 = vsel %vm329_vm2, %v326_v9, %v328_v8  ;;  %v330_v11 = vsel %vm329_vm2, %v324_v7, %v326_v9 }
  0x89   : > { %1005 = vmatprep.subr.msk.bf16.mxu0 %vm336_vm0, %v331_v10  ;;  %v338_v12 = vsel %vm336_vm0, %v330_v11, 0 }
  0x8a   : > { %358 = vmatpush1.bf16.msra.mxu0 %v338_v12 }
  0x8b   : > { %v441_v14 = vpop.permute.xlu1 %440  ;;  %v439_v15 = vpop.permute.xlu0 %438 }
  0x8c   : > { %v443_v16 = vsel %vm442_vm3, %v437_v6, %v439_v15  ;;  %v444_v17 = vsel %vm442_vm3, %v439_v15, %v441_v14 }
  0x8d   : > { %v449_v18 = vsel %vm336_vm0, %v443_v16, 0  ;;  %1006 = vmatmul.mubr.msk.bf16.vlgmr.msra.gmra.mxu0 %vm332_vm1, %v1004_v13  ;;  %1010 = vmatprep.subr.msk.bf16.mxu0 %vm336_vm0, %v444_v17 }
  0x8e   : > { %469 = vmatpush1.bf16.msra.mxu0 %v449_v18  ;;  %486 = vmatprep.mubr.bf16.mxu0 %v1094_v0 }
  0x8f   : > { %v502_v19 = vpop.permute.xlu1 %501  ;;  %v500_v20 = vpop.permute.xlu0 %499 }
  0x90   : > { %v506_v21 = vsel %vm505_vm4, %v500_v20, %v502_v19 }
  0x91   : > { %v512_v26 = vsel %vm336_vm0, %v506_v21, 0 }
  0x93   : > { %v563_v23 = vpop.permute.xlu1 %562  ;;  %v504_v24 = vpop.permute.xlu0 %503 }
  0x94   : > { %v507_v25 = vsel %vm505_vm4, %v502_v19, %v504_v24 }
  0x95   : > { %1011 = vmatmul.mubr.msk.bf16.vlgmr.msra.gmra.mxu0 %vm332_vm1, %v1009_v22  ;;  %1013 = vmatprep.subr.msk.bf16.mxu1 %vm336_vm0, %v507_v25 }
  0x96   : > { %532 = vmatpush1.bf16.msra.mxu1 %v512_v26  ;;  %612 = vmatprep.mubr.bf16.mxu0 %v1094_v0 }
  0x97   : > { %v567_v28 = vpop.permute.xlu1 %566  ;;  %v565_v29 = vpop.permute.xlu0 %564 }
  0x98   : > { %v569_v30 = vsel %vm568_vm5, %v563_v23, %v565_v29  ;;  %v570_v31 = vsel %vm568_vm5, %v565_v29, %v567_v28 }
  0x99   : > { %v575_v32 = vsel %vm336_vm0, %v569_v30, 0  ;;  %1016 = vmatprep.subr.msk.bf16.mxu0 %vm336_vm0, %v570_v31  ;;  %1014 = vmatmul.mubr.msk.bf16.vlgmr.msra.gmra.mxu1 %vm332_vm1, %v1012_v27 }
  0x9a   : > { %595 = vmatpush1.bf16.msra.mxu0 %v575_v32  ;;  %675 = vmatprep.mubr.bf16.mxu1 %v1094_v0 }
  0x9b   : > { %v628_v34 = vpop.permute.xlu1 %627  ;;  %v626_v35 = vpop.permute.xlu0 %625 }
  0x9c   : > { %v632_v36 = vsel %vm631_vm6, %v626_v35, %v628_v34 }
  0x9d   : > { %1017 = vmatmul.mubr.msk.bf16.vlgmr.msra.gmra.mxu0 %vm332_vm1, %v1015_v33  ;;  %v638_v40 = vsel %vm336_vm0, %v632_v36, 0 }
  0x9e   : > { %738 = vmatprep.mubr.bf16.mxu0 %v1094_v0 }
  0x9f   : > { %v689_v37 = vpop.permute.xlu1 %688  ;;  %v630_v38 = vpop.permute.xlu0 %629 }
  0xa0   : > { %v633_v39 = vsel %vm631_vm6, %v628_v34, %v630_v38 }
  0xa1   : > { %1019 = vmatprep.subr.msk.bf16.mxu1 %vm336_vm0, %v633_v39 }
  0xa2   : > { %658 = vmatpush1.bf16.msra.mxu1 %v638_v40 }
  0xa3   : > { %v693_v42 = vpop.permute.xlu1 %692  ;;  %v691_v43 = vpop.permute.xlu0 %690 }
  0xa4   : > { %v695_v44 = vsel %vm694_vm7, %v689_v37, %v691_v43  ;;  %v696_v45 = vsel %vm694_vm7, %v691_v43, %v693_v42 }
  0xa5   : > { %v701_v46 = vsel %vm336_vm0, %v695_v44, 0  ;;  %1020 = vmatmul.mubr.msk.bf16.vlgmr.msra.gmra.mxu1 %vm332_vm1, %v1018_v41  ;;  %1022 = vmatprep.subr.msk.bf16.mxu0 %vm336_vm0, %v696_v45 }
  0xa6   : > { %721 = vmatpush1.bf16.msra.mxu0 %v701_v46  ;;  %801 = vmatprep.mubr.bf16.mxu1 %v1094_v0 }
  0xa7   : > { %v754_v48 = vpop.permute.xlu1 %753  ;;  %v752_v49 = vpop.permute.xlu0 %751  ;;  %1028 = vmatprep.subr.msk.bf16.mxu0 %vm336_vm0, %v1160_v4 }
  0xa8   : > { %v758_v51 = vsel %vm757_vm8, %v752_v49, %v754_v48 }
  0xa9   : > { %1023 = vmatmul.mubr.msk.bf16.vlgmr.msra.gmra.mxu0 %vm332_vm1, %v1021_v47  ;;  %v764_v54 = vsel %vm336_vm0, %v758_v51, 0 }
  0xaa   : > { %835 = vmatpush1.bf16.msra.mxu0 %v391_v50  ;;  %852 = vmatprep.mubr.bf16.mxu0 %v1094_v0  ;;  %v863_v50 = vld [vmem:[%s1245_s7] sm:$0xff] }
  0xab   : > { %v756_v52 = vpop.permute.xlu0 %755 }
  0xac   : > { %v759_v53 = vsel %vm757_vm8, %v754_v48, %v756_v52  ;;  %v870_v52 = vld [vmem:[%s299_s10] sm:$0xff] }
  0xad   : > { %1025 = vmatprep.subr.msk.bf16.mxu1 %vm336_vm0, %v759_v53 }
  0xae   : > { %784 = vmatpush1.bf16.msra.mxu1 %v764_v54 }
  0xb1   : > { %1026 = vmatmul.mubr.msk.bf16.vlgmr.msra.gmra.mxu1 %vm332_vm1, %v1024_v55  ;;  %1029 = vmatmul.mubr.msk.bf16.vlgmr.msra.gmra.mxu0 %vm332_vm1, %v1027_v56 }
  0xd7   : > { %v427_v57 = vpop.f32.mrf.mxu1 }
  0xd9   : > { %v429_v58 = vpop.f32.mrf.mxu1 }
  0xdb   : > { %v431_v59 = vpop.f32.mrf.mxu1 }
  0xdd   : > { %v432_v60 = vpop.f32.mrf.mxu1 }
 0x14d   : > { %v377_v62 = vpop.f32.mrf.mxu0 }
 0x14e   : > { %v428_v14 = vadd.f32 %v427_v57, %v377_v62 }
 0x14f   : > { %v379_v63 = vpop.f32.mrf.mxu0 }
 0x150   : > { %v430_v17 = vadd.f32 %v429_v58, %v379_v63 }
 0x151   : > { %v381_v0 = vpop.f32.mrf.mxu0 }
 0x153   : > { %v382_v1 = vpop.f32.mrf.mxu0 }
 0x155   : > { %v488_v2 = vpop.f32.mrf.mxu0 }
 0x156   : > { %v495_v18 = vadd.f32 %v488_v2, %v428_v14 }
 0x157   : > { %v490_v3 = vpop.f32.mrf.mxu0 }
 0x158   : > { %v496_v21 = vadd.f32 %v490_v3, %v430_v17 }
 0x159   : > { %v492_v4 = vpop.f32.mrf.mxu0  ;;  %v551_v5 = vpop.f32.mrf.mxu1 }
 0x15a   : > { %v558_v22 = vadd.f32 %v551_v5, %v495_v18 }
 0x15b   : > { %v493_v6 = vpop.f32.mrf.mxu0  ;;  %v553_v7 = vpop.f32.mrf.mxu1 }
 0x15c   : > { %v559_v25 = vadd.f32 %v553_v7, %v496_v21 }
 0x15d   : > { %v614_v8 = vpop.f32.mrf.mxu0  ;;  %v555_v9 = vpop.f32.mrf.mxu1 }
 0x15e   : > { %v621_v26 = vadd.f32 %v614_v8, %v558_v22 }
 0x15f   : > { %v616_v10 = vpop.f32.mrf.mxu0  ;;  %v556_v11 = vpop.f32.mrf.mxu1 }
 0x160   : > { %v622_v28 = vadd.f32 %v616_v10, %v559_v25 }
 0x161   : > { %v618_v12 = vpop.f32.mrf.mxu0 }
 0x163   : > { %v619_v13 = vpop.f32.mrf.mxu0 }
 0x165   : > { %v677_v15 = vpop.f32.mrf.mxu1 }
 0x166   : > { %v684_v29 = vadd.f32 %v677_v15, %v621_v26 }
 0x167   : > { %v679_v16 = vpop.f32.mrf.mxu1 }
 0x168   : > { %v685_v31 = vadd.f32 %v679_v16, %v622_v28 }
 0x169   : > { %v740_v19 = vpop.f32.mrf.mxu0  ;;  %v681_v20 = vpop.f32.mrf.mxu1 }
 0x16a   : > { %v747_v32 = vadd.f32 %v740_v19, %v684_v29 }
 0x16b   : > { %v742_v23 = vpop.f32.mrf.mxu0  ;;  %v682_v24 = vpop.f32.mrf.mxu1 }
 0x16c   : > { %v748_v35 = vadd.f32 %v742_v23, %v685_v31 }
 0x16d   : > { %v744_v27 = vpop.f32.mrf.mxu0 }
 0x16f   : > { %v745_v30 = vpop.f32.mrf.mxu0 }
 0x171   : > { %v803_v33 = vpop.f32.mrf.mxu1  ;;  %v854_v34 = vpop.f32.mrf.mxu0 }
 0x172   : > { %v810_v36 = vadd.f32 %v803_v33, %v747_v32 }
 0x173   : > { %v805_v37 = vpop.f32.mrf.mxu1  ;;  %v856_v38 = vpop.f32.mrf.mxu0 }
 0x174   : > { %v861_v39 = vadd.f32 %v854_v34, %v810_v36  ;;  %v811_v40 = vadd.f32 %v805_v37, %v748_v35 }
 0x175   : > { %v807_v41 = vpop.f32.mrf.mxu1  ;;  %v858_v42 = vpop.f32.mrf.mxu0 }
 0x176   : > { %v862_v43 = vadd.f32 %v856_v38, %v811_v40  ;;  %v871_v46 = vmul.f32 %v861_v39, %v861_v39 }
 0x177   : > { %v808_v44 = vpop.f32.mrf.mxu1  ;;  %v859_v45 = vpop.f32.mrf.mxu0 }
 0x178   : > { %v872_v47 = vmul.f32 %v862_v43, %v862_v43  ;;  %v864_v48 = vadd.f32 %v862_v43, %v861_v39 }
 0x17a   : > { %865 = vadd.xlane.f32.xlu1 %v864_v48  ;;  %v873_v49 = vadd.f32 %v872_v47, %v871_v46 }
 0x17c   : > { %874 = vadd.xlane.f32.xlu0 %v873_v49 }
 0x203   : > { %v866_v51 = vpop.xlane.xlu1 %865 }
 0x204   : > { %v867_v53 = vadd.f32 %v866_v51, %v863_v50 }
 0x205   : > { %v875_v54 = vpop.xlane.xlu0 %874 }
 0x206   : > { %869 = vst.msk [vmem:[%s1245_s7] sm:$0xff] %vm305_vm9, %v867_v53  ;;  %v876_v55 = vadd.f32 %v875_v54, %v870_v52 }
 0x208   : > { %877 = vst.msk [vmem:[%s299_s10] sm:$0xff] %vm305_vm9, %v876_v55 }
 0x209 PF: > { %s15_s17 = sadd.s32 1, %s1092_s17   ;;  %s1273_s15 = smov %s1088_s16 }
 0x20a   : > { %p12_p5 = scmp.ge.s32.totalorder %s15_s17, 4   ;;  %s1274_s16 = smov %s1276_s18 }
 0x20c   :  { %14 = sbr.rel (!%p12_p5) target bundleno = 2 (0x2), region = 89 }

</bundles_post_ra>
